<compile_context>
chip_gen: v7x
topology: tpu7x:2x2x1
jax: 0.10.0
libtpu: 0.0.40
codegen_flags: <defaults>
</compile_context>

<pallas_src>
import numpy as np
import jax
import jax.numpy as jnp
from jax.experimental import pallas as pl
from jax.experimental.pallas import tpu as pltpu

F32 = jnp.float32
BF16 = jnp.bfloat16

# Indices of the matrices inside the packed weight slab.
M11, M12, M2, M3, M4, M5 = 0, 1, 2, 3, 4, 5
P2, P2T, P3, P3T, P4, P4T = 6, 7, 8, 9, 10, 11


# ---------------------------------------------------------------------------
# Host-side glue: lower ConvTranspose1d to dense (padded) matrices, build the
# BatchNorm channel projectors, pack everything into two slabs.
# ---------------------------------------------------------------------------
def _convT_mat(W, L_in, stride, padding, pad=128):
    """W: (C_in, C_out, K) torch ConvTranspose1d weight acting on a flattened
    channel-major (C_in*L_in,) activation -> dense (pad, pad) matrix."""
    C_in, C_out, K = W.shape
    L_out = (L_in - 1) * stride - 2 * padding + K
    assert C_in * L_in <= pad and C_out * L_out <= pad
    M = np.zeros((pad, pad), dtype=np.float32)
    rows = np.arange(C_in) * L_in
    cols = np.arange(C_out) * L_out
    for l in range(L_in):
        for k in range(K):
            t = l * stride + k - padding
            if 0 <= t < L_out:
                M[np.ix_(rows + l, cols + t)] += W[:, :, k]
    return M, L_out


def _bn_projectors(C, L, pad=128):
    """Indicator P[pad,pad]: P[c*L + l, c] = 1 (zero elsewhere), plus P^T.
    Padded rows/cols stay zero so padded lanes/channels never contaminate
    the BatchNorm statistics."""
    P = np.zeros((pad, pad), dtype=np.float32)
    for c in range(C):
        P[c * L:(c + 1) * L, c] = 1.0
    return P, np.ascontiguousarray(P.T)


def build_params(key):
    ks = jax.random.split(key, 12)

    def w(k, shape, scale):
        return np.asarray(jax.random.normal(k, shape, dtype=jnp.float32)) * scale

    # torch ConvTranspose1d weights: (in_channels, out_channels, kernel_size)
    W11, b11 = w(ks[0], (128, 128, 3), 0.05), w(ks[1], (128,), 0.01)
    W12 = w(ks[2], (128, 128, 5), 0.05)   # bias exactly cancelled by BN1 batch stats
    W2 = w(ks[4], (128, 32, 4), 0.05)     # bias exactly cancelled by BN2
    W3 = w(ks[6], (32, 8, 4), 0.05)       # bias exactly cancelled by BN3
    W4 = w(ks[8], (8, 2, 8), 0.05)        # bias exactly cancelled by BN4
    W5, b5 = w(ks[10], (2, 1, 9), 0.05), w(ks[11], (1,), 0.01)

    L = 1
    m11, L = _convT_mat(W11, L, stride=1, padding=1)   # L=1,  F=128
    m12, L = _convT_mat(W12, L, stride=1, padding=2)   # L=1,  F=128
    m2, L = _convT_mat(W2, L, stride=1, padding=0)     # L=4,  F=128
    p2, p2t = _bn_projectors(32, L)
    m3, L = _convT_mat(W3, L, stride=4, padding=0)     # L=16, F=128
    p3, p3t = _bn_projectors(8, L)
    m4, L = _convT_mat(W4, L, stride=2, padding=2)     # L=34, F=68 -> padded to 128
    p4, p4t = _bn_projectors(2, L)
    m5, L = _convT_mat(W5, L, stride=1, padding=1)     # L=40, F=40 -> padded to 128
    assert L == 40

    # One bf16 weight slab: 12 x (128,128).  (The 0/1 projectors are exact in bf16.)
    w_slab = np.stack([m11, m12, m2, m3, m4, m5, p2, p2t, p3, p3t, p4, p4t])

    # One f32 slab for all per-channel row-vectors (biases + BN gamma/beta),
    # zero-padded to 128 lanes / 16 rows.
    vecs = np.zeros((16, 128), dtype=np.float32)
    vecs[0, :] = b11                     # conv1_1 bias (L_out = 1)
    vecs[1, :40] = b5[0]                 # conv5 bias repeated over L_out = 40
    # BatchNorm affine params (PyTorch default init: gamma=1, beta=0)
    vecs[2, :] = 1.0                     # g1   (row 3 = be1 = 0)
    vecs[4, :32] = 1.0                   # g2   (row 5 = be2 = 0)
    vecs[6, :8] = 1.0                    # g3   (row 7 = be3 = 0)
    vecs[8, :2] = 1.0                    # g4   (row 9 = be4 = 0)

    return jnp.asarray(w_slab, BF16), jnp.asarray(vecs, F32)


# ---------------------------------------------------------------------------
# Pallas kernel: the whole Generator forward on lane-dense (N, 128) activations
# ---------------------------------------------------------------------------
def _generator_kernel(x_ref, w_ref, v_ref, o_ref):
    V = v_ref[...]                                   # (16, 128) f32
    b11, b5 = V[0:1], V[1:2]
    g1, be1 = V[2:3], V[3:4]
    g2, be2 = V[4:5], V[5:6]
    g3, be3 = V[6:7], V[7:8]
    g4, be4 = V[8:9], V[9:10]

    def conv(a, idx):
        # bf16 x bf16 -> f32 accumulation on the MXU.
        return jnp.dot(a.astype(BF16), w_ref[idx], preferred_element_type=F32)

    def proj(m, idx):
        # Tiny f32 matmul against a 0/1 indicator (exact).
        return jnp.dot(m, w_ref[idx].astype(F32), preferred_element_type=F32)

    def relu(a):
        return jnp.maximum(a, 0.0)

    def bn_dense(a, g, be):
        # BatchNorm1d(128) with L=1: per-channel == per-lane, no projector.
        inv_n = 1.0 / a.shape[0]
        mean = jnp.sum(a, axis=0, keepdims=True) * inv_n
        ex2 = jnp.sum(a * a, axis=0, keepdims=True) * inv_n
        var = jnp.maximum(ex2 - mean * mean, 0.0)        # biased (train-mode) var
        scale = g * jax.lax.rsqrt(var + 1e-5)
        shift = be - scale * mean
        return a * scale + shift

    def bn_grouped(a, g, be, p_idx, pt_idx, L):
        # Training-mode BatchNorm1d(C) over (N, L): one matmul for the stacked
        # [sum(x); sum(x^2)] channel segment-sum, one for the fused
        # [scale; shift] per-channel -> per-lane broadcast.
        inv_nl = 1.0 / (a.shape[0] * L)
        stacked = jnp.concatenate(
            [jnp.sum(a, axis=0, keepdims=True),
             jnp.sum(a * a, axis=0, keepdims=True)], axis=0)       # (2, 128)
        stats = proj(stacked, p_idx) * inv_nl                       # (2, 128)
        mean, ex2 = stats[0:1], stats[1:2]
        var = jnp.maximum(ex2 - mean * mean, 0.0)
        scale = g * jax.lax.rsqrt(var + 1e-5)                       # 0 on padded channels
        shift = be - scale * mean
        ssb = proj(jnp.concatenate([scale, shift], axis=0), pt_idx)  # (2, 128)
        return a * ssb[0:1] + ssb[1:2]

    a = x_ref[...].astype(F32)                                     # (N, 128)
    a = relu(conv(a, M11) + b11)                                   # conv1_1 + ReLU
    a = relu(bn_dense(conv(a, M12), g1, be1))                      # conv1_2 + BN1 + ReLU
    a = relu(bn_grouped(conv(a, M2), g2, be2, P2, P2T, 4))         # conv2 + BN2 + ReLU (32*4)
    a = relu(bn_grouped(conv(a, M3), g3, be3, P3, P3T, 16))        # conv3 + BN3 + ReLU (8*16)
    a = relu(bn_grouped(conv(a, M4), g4, be4, P4, P4T, 34))        # conv4 + BN4 + ReLU (2*34)
    o_ref[...] = jnp.tanh(conv(a, M5) + b5)                        # conv5 + tanh (lanes 0..39 real)


def generator_forward(x, w_slab, vecs):
    """x: (N, 128, 1) float32, NCL like the PyTorch module.  Returns (N, 20, 2)."""
    N = x.shape[0]
    assert x.shape[1:] == (128, 1), "forward is only well-defined for L=1"
    x_flat = x.reshape(N, 128)

    cost = pl.CostEstimate(
        flops=2 * N * 128 * 128 * 6 + 2 * 2 * 128 * 128 * 6,
        transcendentals=N * 128 + 4 * 128,
        bytes_accessed=N * 128 * 4 * 2 + int(w_slab.size) * 2 + int(vecs.size) * 4,
    )

    out_flat = pl.pallas_call(
        _generator_kernel,
        out_shape=jax.ShapeDtypeStruct((N, 128), F32),   # lane-dense padded output
        in_specs=[pl.BlockSpec(memory_space=pltpu.MemorySpace.VMEM)] * 3,
        out_specs=pl.BlockSpec(memory_space=pltpu.MemorySpace.VMEM),
        cost_estimate=cost,
    )(x_flat, w_slab, vecs)

    # torch: transpose(cat((x[:, :, :20], x[:, :, 20:]), dim=1), 1, 2) -> (N, 20, 2)
    return jnp.stack([out_flat[:, :20], out_flat[:, 20:40]], axis=-1)


if __name__ == "__main__":
    key = jax.random.PRNGKey(0)
    k_x, k_p = jax.random.split(key)

    N = 2
    x = jax.random.normal(k_x, (N, 128, 1), dtype=jnp.float32)
    w_slab, vecs = build_params(k_p)

    traj = jax.block_until_ready(generator_forward(x, w_slab, vecs))

    assert traj.shape == (N, 20, 2), traj.shape
    assert bool(jnp.all(jnp.isfinite(traj)))
    print("KERNEL_OK")
</pallas_src>

<mosaic_0001>
module attributes {stable_mosaic.version = 11 : i64} {
  func.func @_generator_kernel(%arg0: memref<2x128xf32, #tpu.memory_space<vmem>>, %arg1: memref<12x128x128xbf16, #tpu.memory_space<vmem>>, %arg2: memref<16x128xf32, #tpu.memory_space<vmem>>, %arg3: memref<2x128xf32, #tpu.memory_space<vmem>>) attributes {dimension_semantics = [], scalar_prefetch = 0 : i64, scratch_operands = 0 : i64, tpu.core_type = #tpu.core_type<tc>} {
    %c0 = arith.constant 0 : index
    %c0_0 = arith.constant 0 : index
    %0 = vector.load %arg2[%c0, %c0_0] : memref<16x128xf32, #tpu.memory_space<vmem>>, vector<16x128xf32>
    %1 = vector.extract_strided_slice %0 {offsets = [0, 0], sizes = [1, 128], strides = [1, 1]} : vector<16x128xf32> to vector<1x128xf32>
    %2 = vector.extract_strided_slice %0 {offsets = [1, 0], sizes = [1, 128], strides = [1, 1]} : vector<16x128xf32> to vector<1x128xf32>
    %3 = vector.extract_strided_slice %0 {offsets = [2, 0], sizes = [1, 128], strides = [1, 1]} : vector<16x128xf32> to vector<1x128xf32>
    %4 = vector.extract_strided_slice %0 {offsets = [3, 0], sizes = [1, 128], strides = [1, 1]} : vector<16x128xf32> to vector<1x128xf32>
    %5 = vector.extract_strided_slice %0 {offsets = [4, 0], sizes = [1, 128], strides = [1, 1]} : vector<16x128xf32> to vector<1x128xf32>
    %6 = vector.extract_strided_slice %0 {offsets = [5, 0], sizes = [1, 128], strides = [1, 1]} : vector<16x128xf32> to vector<1x128xf32>
    %7 = vector.extract_strided_slice %0 {offsets = [6, 0], sizes = [1, 128], strides = [1, 1]} : vector<16x128xf32> to vector<1x128xf32>
    %8 = vector.extract_strided_slice %0 {offsets = [7, 0], sizes = [1, 128], strides = [1, 1]} : vector<16x128xf32> to vector<1x128xf32>
    %9 = vector.extract_strided_slice %0 {offsets = [8, 0], sizes = [1, 128], strides = [1, 1]} : vector<16x128xf32> to vector<1x128xf32>
    %10 = vector.extract_strided_slice %0 {offsets = [9, 0], sizes = [1, 128], strides = [1, 1]} : vector<16x128xf32> to vector<1x128xf32>
    %c0_1 = arith.constant 0 : index
    %c0_2 = arith.constant 0 : index
    %11 = vector.load %arg0[%c0_1, %c0_2] : memref<2x128xf32, #tpu.memory_space<vmem>>, vector<2x128xf32>
    %12 = arith.truncf %11 : vector<2x128xf32> to vector<2x128xbf16>
    %c0_3 = arith.constant 0 : index
    %c0_4 = arith.constant 0 : index
    %c0_5 = arith.constant 0 : index
    %13 = vector.load %arg1[%c0_3, %c0_4, %c0_5] : memref<12x128x128xbf16, #tpu.memory_space<vmem>>, vector<1x128x128xbf16>
    %14 = vector.shape_cast %13 : vector<1x128x128xbf16> to vector<128x128xbf16>
    %cst = arith.constant dense<0.000000e+00> : vector<2x128xf32>
    %15 = tpu.matmul %12, %14, %cst {dimension_numbers = #tpu.dot_dimension_numbers<[1], [0], [0], [1], [0, 0, 1, 1], [], []>} : vector<2x128xbf16>, vector<128x128xbf16>, vector<2x128xf32> -> vector<2x128xf32>
    %16 = vector.broadcast %1 : vector<1x128xf32> to vector<2x128xf32>
    %17 = arith.addf %15, %16 : vector<2x128xf32>
    %cst_6 = arith.constant 0.000000e+00 : f32
    %18 = vector.broadcast %cst_6 : f32 to vector<2x128xf32>
    %19 = arith.maximumf %17, %18 : vector<2x128xf32>
    %20 = arith.truncf %19 : vector<2x128xf32> to vector<2x128xbf16>
    %c1 = arith.constant 1 : index
    %c0_7 = arith.constant 0 : index
    %c0_8 = arith.constant 0 : index
    %21 = vector.load %arg1[%c1, %c0_7, %c0_8] : memref<12x128x128xbf16, #tpu.memory_space<vmem>>, vector<1x128x128xbf16>
    %22 = vector.shape_cast %21 : vector<1x128x128xbf16> to vector<128x128xbf16>
    %cst_9 = arith.constant dense<0.000000e+00> : vector<2x128xf32>
    %23 = tpu.matmul %20, %22, %cst_9 {dimension_numbers = #tpu.dot_dimension_numbers<[1], [0], [0], [1], [0, 0, 1, 1], [], []>} : vector<2x128xbf16>, vector<128x128xbf16>, vector<2x128xf32> -> vector<2x128xf32>
    %cst_10 = arith.constant dense<0.000000e+00> : vector<128xf32>
    %24 = vector.multi_reduction <add>, %23, %cst_10 [0] : vector<2x128xf32> to vector<128xf32>
    %25 = vector.shape_cast %24 : vector<128xf32> to vector<1x128xf32>
    %cst_11 = arith.constant 5.000000e-01 : f32
    %26 = vector.broadcast %cst_11 : f32 to vector<1x128xf32>
    %27 = arith.mulf %25, %26 : vector<1x128xf32>
    %28 = arith.mulf %23, %23 : vector<2x128xf32>
    %cst_12 = arith.constant dense<0.000000e+00> : vector<128xf32>
    %29 = vector.multi_reduction <add>, %28, %cst_12 [0] : vector<2x128xf32> to vector<128xf32>
    %30 = vector.shape_cast %29 : vector<128xf32> to vector<1x128xf32>
    %cst_13 = arith.constant 5.000000e-01 : f32
    %31 = vector.broadcast %cst_13 : f32 to vector<1x128xf32>
    %32 = arith.mulf %30, %31 : vector<1x128xf32>
    %33 = arith.mulf %27, %27 : vector<1x128xf32>
    %34 = arith.subf %32, %33 : vector<1x128xf32>
    %cst_14 = arith.constant 0.000000e+00 : f32
    %35 = vector.broadcast %cst_14 : f32 to vector<1x128xf32>
    %36 = arith.maximumf %34, %35 : vector<1x128xf32>
    %cst_15 = arith.constant 9.99999974E-6 : f32
    %37 = vector.broadcast %cst_15 : f32 to vector<1x128xf32>
    %38 = arith.addf %36, %37 : vector<1x128xf32>
    %39 = math.rsqrt %38 : vector<1x128xf32>
    %40 = arith.mulf %3, %39 : vector<1x128xf32>
    %41 = arith.mulf %40, %27 : vector<1x128xf32>
    %42 = arith.subf %4, %41 : vector<1x128xf32>
    %43 = vector.broadcast %40 : vector<1x128xf32> to vector<2x128xf32>
    %44 = arith.mulf %23, %43 : vector<2x128xf32>
    %45 = vector.broadcast %42 : vector<1x128xf32> to vector<2x128xf32>
    %46 = arith.addf %44, %45 : vector<2x128xf32>
    %cst_16 = arith.constant 0.000000e+00 : f32
    %47 = vector.broadcast %cst_16 : f32 to vector<2x128xf32>
    %48 = arith.maximumf %46, %47 : vector<2x128xf32>
    %49 = arith.truncf %48 : vector<2x128xf32> to vector<2x128xbf16>
    %c2 = arith.constant 2 : index
    %c0_17 = arith.constant 0 : index
    %c0_18 = arith.constant 0 : index
    %50 = vector.load %arg1[%c2, %c0_17, %c0_18] : memref<12x128x128xbf16, #tpu.memory_space<vmem>>, vector<1x128x128xbf16>
    %51 = vector.shape_cast %50 : vector<1x128x128xbf16> to vector<128x128xbf16>
    %cst_19 = arith.constant dense<0.000000e+00> : vector<2x128xf32>
    %52 = tpu.matmul %49, %51, %cst_19 {dimension_numbers = #tpu.dot_dimension_numbers<[1], [0], [0], [1], [0, 0, 1, 1], [], []>} : vector<2x128xbf16>, vector<128x128xbf16>, vector<2x128xf32> -> vector<2x128xf32>
    %cst_20 = arith.constant dense<0.000000e+00> : vector<128xf32>
    %53 = vector.multi_reduction <add>, %52, %cst_20 [0] : vector<2x128xf32> to vector<128xf32>
    %54 = vector.shape_cast %53 : vector<128xf32> to vector<1x128xf32>
    %55 = arith.mulf %52, %52 : vector<2x128xf32>
    %cst_21 = arith.constant dense<0.000000e+00> : vector<128xf32>
    %56 = vector.multi_reduction <add>, %55, %cst_21 [0] : vector<2x128xf32> to vector<128xf32>
    %57 = vector.shape_cast %56 : vector<128xf32> to vector<1x128xf32>
    %58 = tpu.concatenate %54, %57 in 0 : vector<1x128xf32>, vector<1x128xf32> -> vector<2x128xf32>
    %c6 = arith.constant 6 : index
    %c0_22 = arith.constant 0 : index
    %c0_23 = arith.constant 0 : index
    %59 = vector.load %arg1[%c6, %c0_22, %c0_23] : memref<12x128x128xbf16, #tpu.memory_space<vmem>>, vector<1x128x128xbf16>
    %60 = vector.shape_cast %59 : vector<1x128x128xbf16> to vector<128x128xbf16>
    %61 = arith.extf %60 : vector<128x128xbf16> to vector<128x128xf32>
    %cst_24 = arith.constant dense<0.000000e+00> : vector<2x128xf32>
    %62 = tpu.matmul %58, %61, %cst_24 {dimension_numbers = #tpu.dot_dimension_numbers<[1], [0], [0], [1], [0, 0, 1, 1], [], []>} : vector<2x128xf32>, vector<128x128xf32>, vector<2x128xf32> -> vector<2x128xf32>
    %cst_25 = arith.constant 1.250000e-01 : f32
    %63 = vector.broadcast %cst_25 : f32 to vector<2x128xf32>
    %64 = arith.mulf %62, %63 : vector<2x128xf32>
    %65 = vector.extract_strided_slice %64 {offsets = [0, 0], sizes = [1, 128], strides = [1, 1]} : vector<2x128xf32> to vector<1x128xf32>
    %66 = vector.extract_strided_slice %64 {offsets = [1, 0], sizes = [1, 128], strides = [1, 1]} : vector<2x128xf32> to vector<1x128xf32>
    %67 = arith.mulf %65, %65 : vector<1x128xf32>
    %68 = arith.subf %66, %67 : vector<1x128xf32>
    %cst_26 = arith.constant 0.000000e+00 : f32
    %69 = vector.broadcast %cst_26 : f32 to vector<1x128xf32>
    %70 = arith.maximumf %68, %69 : vector<1x128xf32>
    %cst_27 = arith.constant 9.99999974E-6 : f32
    %71 = vector.broadcast %cst_27 : f32 to vector<1x128xf32>
    %72 = arith.addf %70, %71 : vector<1x128xf32>
    %73 = math.rsqrt %72 : vector<1x128xf32>
    %74 = arith.mulf %5, %73 : vector<1x128xf32>
    %75 = arith.mulf %74, %65 : vector<1x128xf32>
    %76 = arith.subf %6, %75 : vector<1x128xf32>
    %77 = tpu.concatenate %74, %76 in 0 : vector<1x128xf32>, vector<1x128xf32> -> vector<2x128xf32>
    %c7 = arith.constant 7 : index
    %c0_28 = arith.constant 0 : index
    %c0_29 = arith.constant 0 : index
    %78 = vector.load %arg1[%c7, %c0_28, %c0_29] : memref<12x128x128xbf16, #tpu.memory_space<vmem>>, vector<1x128x128xbf16>
    %79 = vector.shape_cast %78 : vector<1x128x128xbf16> to vector<128x128xbf16>
    %80 = arith.extf %79 : vector<128x128xbf16> to vector<128x128xf32>
    %cst_30 = arith.constant dense<0.000000e+00> : vector<2x128xf32>
    %81 = tpu.matmul %77, %80, %cst_30 {dimension_numbers = #tpu.dot_dimension_numbers<[1], [0], [0], [1], [0, 0, 1, 1], [], []>} : vector<2x128xf32>, vector<128x128xf32>, vector<2x128xf32> -> vector<2x128xf32>
    %82 = vector.extract_strided_slice %81 {offsets = [0, 0], sizes = [1, 128], strides = [1, 1]} : vector<2x128xf32> to vector<1x128xf32>
    %83 = vector.broadcast %82 : vector<1x128xf32> to vector<2x128xf32>
    %84 = arith.mulf %52, %83 : vector<2x128xf32>
    %85 = vector.extract_strided_slice %81 {offsets = [1, 0], sizes = [1, 128], strides = [1, 1]} : vector<2x128xf32> to vector<1x128xf32>
    %86 = vector.broadcast %85 : vector<1x128xf32> to vector<2x128xf32>
    %87 = arith.addf %84, %86 : vector<2x128xf32>
    %cst_31 = arith.constant 0.000000e+00 : f32
    %88 = vector.broadcast %cst_31 : f32 to vector<2x128xf32>
    %89 = arith.maximumf %87, %88 : vector<2x128xf32>
    %90 = arith.truncf %89 : vector<2x128xf32> to vector<2x128xbf16>
    %c3 = arith.constant 3 : index
    %c0_32 = arith.constant 0 : index
    %c0_33 = arith.constant 0 : index
    %91 = vector.load %arg1[%c3, %c0_32, %c0_33] : memref<12x128x128xbf16, #tpu.memory_space<vmem>>, vector<1x128x128xbf16>
    %92 = vector.shape_cast %91 : vector<1x128x128xbf16> to vector<128x128xbf16>
    %cst_34 = arith.constant dense<0.000000e+00> : vector<2x128xf32>
    %93 = tpu.matmul %90, %92, %cst_34 {dimension_numbers = #tpu.dot_dimension_numbers<[1], [0], [0], [1], [0, 0, 1, 1], [], []>} : vector<2x128xbf16>, vector<128x128xbf16>, vector<2x128xf32> -> vector<2x128xf32>
    %cst_35 = arith.constant dense<0.000000e+00> : vector<128xf32>
    %94 = vector.multi_reduction <add>, %93, %cst_35 [0] : vector<2x128xf32> to vector<128xf32>
    %95 = vector.shape_cast %94 : vector<128xf32> to vector<1x128xf32>
    %96 = arith.mulf %93, %93 : vector<2x128xf32>
    %cst_36 = arith.constant dense<0.000000e+00> : vector<128xf32>
    %97 = vector.multi_reduction <add>, %96, %cst_36 [0] : vector<2x128xf32> to vector<128xf32>
    %98 = vector.shape_cast %97 : vector<128xf32> to vector<1x128xf32>
    %99 = tpu.concatenate %95, %98 in 0 : vector<1x128xf32>, vector<1x128xf32> -> vector<2x128xf32>
    %c8 = arith.constant 8 : index
    %c0_37 = arith.constant 0 : index
    %c0_38 = arith.constant 0 : index
    %100 = vector.load %arg1[%c8, %c0_37, %c0_38] : memref<12x128x128xbf16, #tpu.memory_space<vmem>>, vector<1x128x128xbf16>
    %101 = vector.shape_cast %100 : vector<1x128x128xbf16> to vector<128x128xbf16>
    %102 = arith.extf %101 : vector<128x128xbf16> to vector<128x128xf32>
    %cst_39 = arith.constant dense<0.000000e+00> : vector<2x128xf32>
    %103 = tpu.matmul %99, %102, %cst_39 {dimension_numbers = #tpu.dot_dimension_numbers<[1], [0], [0], [1], [0, 0, 1, 1], [], []>} : vector<2x128xf32>, vector<128x128xf32>, vector<2x128xf32> -> vector<2x128xf32>
    %cst_40 = arith.constant 3.125000e-02 : f32
    %104 = vector.broadcast %cst_40 : f32 to vector<2x128xf32>
    %105 = arith.mulf %103, %104 : vector<2x128xf32>
    %106 = vector.extract_strided_slice %105 {offsets = [0, 0], sizes = [1, 128], strides = [1, 1]} : vector<2x128xf32> to vector<1x128xf32>
    %107 = vector.extract_strided_slice %105 {offsets = [1, 0], sizes = [1, 128], strides = [1, 1]} : vector<2x128xf32> to vector<1x128xf32>
    %108 = arith.mulf %106, %106 : vector<1x128xf32>
    %109 = arith.subf %107, %108 : vector<1x128xf32>
    %cst_41 = arith.constant 0.000000e+00 : f32
    %110 = vector.broadcast %cst_41 : f32 to vector<1x128xf32>
    %111 = arith.maximumf %109, %110 : vector<1x128xf32>
    %cst_42 = arith.constant 9.99999974E-6 : f32
    %112 = vector.broadcast %cst_42 : f32 to vector<1x128xf32>
    %113 = arith.addf %111, %112 : vector<1x128xf32>
    %114 = math.rsqrt %113 : vector<1x128xf32>
    %115 = arith.mulf %7, %114 : vector<1x128xf32>
    %116 = arith.mulf %115, %106 : vector<1x128xf32>
    %117 = arith.subf %8, %116 : vector<1x128xf32>
    %118 = tpu.concatenate %115, %117 in 0 : vector<1x128xf32>, vector<1x128xf32> -> vector<2x128xf32>
    %c9 = arith.constant 9 : index
    %c0_43 = arith.constant 0 : index
    %c0_44 = arith.constant 0 : index
    %119 = vector.load %arg1[%c9, %c0_43, %c0_44] : memref<12x128x128xbf16, #tpu.memory_space<vmem>>, vector<1x128x128xbf16>
    %120 = vector.shape_cast %119 : vector<1x128x128xbf16> to vector<128x128xbf16>
    %121 = arith.extf %120 : vector<128x128xbf16> to vector<128x128xf32>
    %cst_45 = arith.constant dense<0.000000e+00> : vector<2x128xf32>
    %122 = tpu.matmul %118, %121, %cst_45 {dimension_numbers = #tpu.dot_dimension_numbers<[1], [0], [0], [1], [0, 0, 1, 1], [], []>} : vector<2x128xf32>, vector<128x128xf32>, vector<2x128xf32> -> vector<2x128xf32>
    %123 = vector.extract_strided_slice %122 {offsets = [0, 0], sizes = [1, 128], strides = [1, 1]} : vector<2x128xf32> to vector<1x128xf32>
    %124 = vector.broadcast %123 : vector<1x128xf32> to vector<2x128xf32>
    %125 = arith.mulf %93, %124 : vector<2x128xf32>
    %126 = vector.extract_strided_slice %122 {offsets = [1, 0], sizes = [1, 128], strides = [1, 1]} : vector<2x128xf32> to vector<1x128xf32>
    %127 = vector.broadcast %126 : vector<1x128xf32> to vector<2x128xf32>
    %128 = arith.addf %125, %127 : vector<2x128xf32>
    %cst_46 = arith.constant 0.000000e+00 : f32
    %129 = vector.broadcast %cst_46 : f32 to vector<2x128xf32>
    %130 = arith.maximumf %128, %129 : vector<2x128xf32>
    %131 = arith.truncf %130 : vector<2x128xf32> to vector<2x128xbf16>
    %c4 = arith.constant 4 : index
    %c0_47 = arith.constant 0 : index
    %c0_48 = arith.constant 0 : index
    %132 = vector.load %arg1[%c4, %c0_47, %c0_48] : memref<12x128x128xbf16, #tpu.memory_space<vmem>>, vector<1x128x128xbf16>
    %133 = vector.shape_cast %132 : vector<1x128x128xbf16> to vector<128x128xbf16>
    %cst_49 = arith.constant dense<0.000000e+00> : vector<2x128xf32>
    %134 = tpu.matmul %131, %133, %cst_49 {dimension_numbers = #tpu.dot_dimension_numbers<[1], [0], [0], [1], [0, 0, 1, 1], [], []>} : vector<2x128xbf16>, vector<128x128xbf16>, vector<2x128xf32> -> vector<2x128xf32>
    %cst_50 = arith.constant dense<0.000000e+00> : vector<128xf32>
    %135 = vector.multi_reduction <add>, %134, %cst_50 [0] : vector<2x128xf32> to vector<128xf32>
    %136 = vector.shape_cast %135 : vector<128xf32> to vector<1x128xf32>
    %137 = arith.mulf %134, %134 : vector<2x128xf32>
    %cst_51 = arith.constant dense<0.000000e+00> : vector<128xf32>
    %138 = vector.multi_reduction <add>, %137, %cst_51 [0] : vector<2x128xf32> to vector<128xf32>
    %139 = vector.shape_cast %138 : vector<128xf32> to vector<1x128xf32>
    %140 = tpu.concatenate %136, %139 in 0 : vector<1x128xf32>, vector<1x128xf32> -> vector<2x128xf32>
    %c10 = arith.constant 10 : index
    %c0_52 = arith.constant 0 : index
    %c0_53 = arith.constant 0 : index
    %141 = vector.load %arg1[%c10, %c0_52, %c0_53] : memref<12x128x128xbf16, #tpu.memory_space<vmem>>, vector<1x128x128xbf16>
    %142 = vector.shape_cast %141 : vector<1x128x128xbf16> to vector<128x128xbf16>
    %143 = arith.extf %142 : vector<128x128xbf16> to vector<128x128xf32>
    %cst_54 = arith.constant dense<0.000000e+00> : vector<2x128xf32>
    %144 = tpu.matmul %140, %143, %cst_54 {dimension_numbers = #tpu.dot_dimension_numbers<[1], [0], [0], [1], [0, 0, 1, 1], [], []>} : vector<2x128xf32>, vector<128x128xf32>, vector<2x128xf32> -> vector<2x128xf32>
    %cst_55 = arith.constant 0.0147058824 : f32
    %145 = vector.broadcast %cst_55 : f32 to vector<2x128xf32>
    %146 = arith.mulf %144, %145 : vector<2x128xf32>
    %147 = vector.extract_strided_slice %146 {offsets = [0, 0], sizes = [1, 128], strides = [1, 1]} : vector<2x128xf32> to vector<1x128xf32>
    %148 = vector.extract_strided_slice %146 {offsets = [1, 0], sizes = [1, 128], strides = [1, 1]} : vector<2x128xf32> to vector<1x128xf32>
    %149 = arith.mulf %147, %147 : vector<1x128xf32>
    %150 = arith.subf %148, %149 : vector<1x128xf32>
    %cst_56 = arith.constant 0.000000e+00 : f32
    %151 = vector.broadcast %cst_56 : f32 to vector<1x128xf32>
    %152 = arith.maximumf %150, %151 : vector<1x128xf32>
    %cst_57 = arith.constant 9.99999974E-6 : f32
    %153 = vector.broadcast %cst_57 : f32 to vector<1x128xf32>
    %154 = arith.addf %152, %153 : vector<1x128xf32>
    %155 = math.rsqrt %154 : vector<1x128xf32>
    %156 = arith.mulf %9, %155 : vector<1x128xf32>
    %157 = arith.mulf %156, %147 : vector<1x128xf32>
    %158 = arith.subf %10, %157 : vector<1x128xf32>
    %159 = tpu.concatenate %156, %158 in 0 : vector<1x128xf32>, vector<1x128xf32> -> vector<2x128xf32>
    %c11 = arith.constant 11 : index
    %c0_58 = arith.constant 0 : index
    %c0_59 = arith.constant 0 : index
    %160 = vector.load %arg1[%c11, %c0_58, %c0_59] : memref<12x128x128xbf16, #tpu.memory_space<vmem>>, vector<1x128x128xbf16>
    %161 = vector.shape_cast %160 : vector<1x128x128xbf16> to vector<128x128xbf16>
    %162 = arith.extf %161 : vector<128x128xbf16> to vector<128x128xf32>
    %cst_60 = arith.constant dense<0.000000e+00> : vector<2x128xf32>
    %163 = tpu.matmul %159, %162, %cst_60 {dimension_numbers = #tpu.dot_dimension_numbers<[1], [0], [0], [1], [0, 0, 1, 1], [], []>} : vector<2x128xf32>, vector<128x128xf32>, vector<2x128xf32> -> vector<2x128xf32>
    %164 = vector.extract_strided_slice %163 {offsets = [0, 0], sizes = [1, 128], strides = [1, 1]} : vector<2x128xf32> to vector<1x128xf32>
    %165 = vector.broadcast %164 : vector<1x128xf32> to vector<2x128xf32>
    %166 = arith.mulf %134, %165 : vector<2x128xf32>
    %167 = vector.extract_strided_slice %163 {offsets = [1, 0], sizes = [1, 128], strides = [1, 1]} : vector<2x128xf32> to vector<1x128xf32>
    %168 = vector.broadcast %167 : vector<1x128xf32> to vector<2x128xf32>
    %169 = arith.addf %166, %168 : vector<2x128xf32>
    %cst_61 = arith.constant 0.000000e+00 : f32
    %170 = vector.broadcast %cst_61 : f32 to vector<2x128xf32>
    %171 = arith.maximumf %169, %170 : vector<2x128xf32>
    %172 = arith.truncf %171 : vector<2x128xf32> to vector<2x128xbf16>
    %c5 = arith.constant 5 : index
    %c0_62 = arith.constant 0 : index
    %c0_63 = arith.constant 0 : index
    %173 = vector.load %arg1[%c5, %c0_62, %c0_63] : memref<12x128x128xbf16, #tpu.memory_space<vmem>>, vector<1x128x128xbf16>
    %174 = vector.shape_cast %173 : vector<1x128x128xbf16> to vector<128x128xbf16>
    %cst_64 = arith.constant dense<0.000000e+00> : vector<2x128xf32>
    %175 = tpu.matmul %172, %174, %cst_64 {dimension_numbers = #tpu.dot_dimension_numbers<[1], [0], [0], [1], [0, 0, 1, 1], [], []>} : vector<2x128xbf16>, vector<128x128xbf16>, vector<2x128xf32> -> vector<2x128xf32>
    %176 = vector.broadcast %2 : vector<1x128xf32> to vector<2x128xf32>
    %177 = arith.addf %175, %176 : vector<2x128xf32>
    %178 = math.tanh %177 : vector<2x128xf32>
    %c0_65 = arith.constant 0 : index
    %c0_66 = arith.constant 0 : index
    %179 = vector.load %arg3[%c0_65, %c0_66] : memref<2x128xf32, #tpu.memory_space<vmem>>, vector<2x128xf32>
    tpu.vector_store %arg3[%c0_65, %c0_66], %178 {strides = array<i32>} : memref<2x128xf32, #tpu.memory_space<vmem>>, vector<2x128xf32>,
    return
  }
}

</mosaic_0001>

<bundles_post_ra>
// kernel: tpu_custom_call.1
= control target key start
LH: loop header
LB: loop body
LE: loop exit
PB: predicated region body
PF: predicated region fallthrough
CT: control target
= control target key end

     0   :  { %8 = vsyncpa [#allocation3], 0  ;;  %s2869_s0 = inlined_call_operand.hbm [shape: f32[2,128], index: 0, kind: input, shape index: {}]   ;;  %s2870_s1 = inlined_call_operand.hbm [shape: bf16[12,128,128], index: 1, kind: input, shape index: {}]   ;;  %s2871_s2 = inlined_call_operand.hbm [shape: f32[16,128], index: 2, kind: input, shape index: {}]   ;;  %s2872_s3 = inlined_call_operand.hbm [shape: f32[2,128], index: 3, kind: output, shape index: {}]  }
   0x1   :  { %9 = vsyncpa [#allocation6], 0 }
   0x2   :  { %10 = vsyncpa [#allocation4], 0  ;;  %s2610_s12 = smov [#allocation5]   ;;  %s2516_s16 = scalar_lea.hbm %s2870_s1, 12288 }
   0x3   :  { %s26_s13 = sshll.u32 %s2610_s12, 4  ;;  %p2517_p0 = scmp.ne.s32.totalorder %s2870_s1, %s2516_s16  ;;  %s27_s13 = int_to_ptr.vmem [resolvable:$true] %s26_s13 }
   0x4   :  { %p2520_p1 = scmp.lt.u32.totalorder %s2516_s16, %s2870_s1 }
   0x6   :  { %p2522_p2 = pnand %p2520_p1, %p2517_p0 }
   0x8   :  { %2525 = shalt.err (!%p2522_p2)
}
   0x9   :  { %s2526_s21 = scalar_lea.vmem %s27_s13, 12288  ;;  %p2531_p4 = scmp.lt.s32.totalorder %s27_s13, %s27_s13 }
   0xa   :  { %p2527_p3 = scmp.ne.s32.totalorder %s27_s13, %s2526_s21  ;;  %p2532_p5 = scmp.lt.s32.totalorder %s2526_s21, %s2526_s21 }
   0xc   :  { %p2533_p6 = por %p2532_p5, %p2531_p4 }
   0xe   :  { %p2534_p7 = pnand %p2533_p6, %p2527_p3 }
  0x10   :  { %2537 = shalt.err (!%p2534_p7)
}
  0x11   :  { %s2611_s22 = smov 64   ;;  %s2612_s23 = smov 4  }
  0x12   :  { %32 = dma.hbm_to_vmem [thread:$0]  %s2870_s1, 12288, %s27_s13, [#allocation6], %s2611_s22, %s2611_s22, %s2612_s23  }
  0x13   :  { %s2613_s26 = smov [#allocation2]   ;;  %s2614_s28 = smov [#allocation7]  }
  0x14   :  { %s17_s27 = sshll.u32 %s2613_s26, 4  ;;  %s38_s29 = sshll.u32 %s2614_s28, 4  ;;  %s18_s27 = int_to_ptr.vmem [resolvable:$true] %s17_s27  ;;  %s39_s29 = int_to_ptr.vmem [resolvable:$true] %s38_s29 }
  0x15   :  { %s2538_s5 = scalar_lea.hbm %s2869_s0, 32 }
  0x16   :  { %p2539_p8 = scmp.ne.s32.totalorder %s2869_s0, %s2538_s5  ;;  %p2542_p9 = scmp.lt.u32.totalorder %s2538_s5, %s2869_s0 }
  0x18   :  { %p2544_p10 = pnand %p2542_p9, %p2539_p8 }
  0x1a   :  { %2547 = shalt.err (!%p2544_p10)
}
  0x1b   :  { %s2548_s1 = scalar_lea.vmem %s18_s27, 32  ;;  %p2553_p12 = scmp.lt.s32.totalorder %s18_s27, %s18_s27 }
  0x1c   :  { %p2549_p11 = scmp.ne.s32.totalorder %s18_s27, %s2548_s1  ;;  %p2554_p13 = scmp.lt.s32.totalorder %s2548_s1, %s2548_s1 }
  0x1e   :  { %p2555_p0 = por %p2554_p13, %p2553_p12 }
  0x20   :  { %p2556_p1 = pnand %p2555_p0, %p2549_p11 }
  0x22   :  { %2559 = shalt.err (!%p2556_p1)
}
  0x23   :  { %20 = dma.hbm_to_vmem [thread:$0]  %s2869_s0, 32, %s18_s27, [#allocation3]  }
  0x24   :  { %s2560_s14 = scalar_lea.hbm %s2871_s2, 256 }
  0x25   :  { %p2561_p2 = scmp.ne.s32.totalorder %s2871_s2, %s2560_s14  ;;  %p2564_p3 = scmp.lt.u32.totalorder %s2560_s14, %s2871_s2 }
  0x27   :  { %p2566_p4 = pnand %p2564_p3, %p2561_p2 }
  0x29   :  { %2569 = shalt.err (!%p2566_p4)
}
  0x2a   :  { %s2570_s19 = scalar_lea.vmem %s39_s29, 256  ;;  %p2575_p6 = scmp.lt.s32.totalorder %s39_s29, %s39_s29 }
  0x2b   :  { %p2571_p5 = scmp.ne.s32.totalorder %s39_s29, %s2570_s19  ;;  %p2576_p7 = scmp.lt.s32.totalorder %s2570_s19, %s2570_s19 }
  0x2d   :  { %p2577_p8 = por %p2576_p7, %p2575_p6 }
  0x2f   :  { %p2578_p9 = pnand %p2577_p8, %p2571_p5 }
  0x31   :  { %2581 = shalt.err (!%p2578_p9)
}
  0x32   :  { %s2615_s0 = smov 128   ;;  %s2616_s20 = smov 8  }
  0x33   :  { %44 = dma.hbm_to_vmem [thread:$0]  %s2871_s2, 256, %s39_s29, [#allocation6], %s2615_s0, %s2615_s0, %s2616_s20  }
  0x34   :  { %2604 = dma.done.wait [#allocation3], 32  }
  0x35   :  { %2605 = vsyncadd [#allocation3], 4294967264 }
  0x36   :  { %2606 = dma.done.wait [#allocation6], 12544  }
  0x37   :  { %2607 = vsyncadd [#allocation6], 4294954752  ;;  %v2617_v0 = vmov 0.0   ;;  %vm2618_vm0 = vmmov 0   ;;  %v2458_v1 = vld [vmem:[#allocation5] sm:$0xff]   ;;  %v2459_v2 = vld [vmem:[#allocation5 + $0x8] sm:$0xff]   ;;  %v75_v19 = vlaneseq }
  0x38   :  { %1973 = vmatprep.subr.bf16.mxu0 %v2617_v0  ;;  %1989 = vmatprep.mubr.msk.bf16.mxu0 %vm2618_vm0, %v2617_v0  ;;  %v2460_v3 = vld [vmem:[#allocation5 + $0x10] sm:$0xff]   ;;  %v2466_v4 = vld [vmem:[#allocation5 + $0x40] sm:$0xff]   ;;  %v2461_v5 = vld [vmem:[#allocation5 + $0x18] sm:$0xff]   ;;  %v2619_v40 = vmov 0.0|0.0   ;;  %vm274_vm1 = vcmask 1041408   ;;  %vm435_vm2 = vcmask 1040384  }
  0x39   :  { %1993 = vmatprep.subr.bf16.mxu1 %v2617_v0  ;;  %2009 = vmatprep.mubr.msk.bf16.mxu1 %vm2618_vm0, %v2617_v0  ;;  %v2467_v6 = vld [vmem:[#allocation5 + $0x48] sm:$0xff]   ;;  %v2462_v7 = vld [vmem:[#allocation5 + $0x20] sm:$0xff]   ;;  %v2468_v8 = vld [vmem:[#allocation5 + $0x50] sm:$0xff]   ;;  %v2700_v20 = vshrl.u32 %v75_v19, 7  ;;  %s2620_s2 = smov [#allocation8]  }
  0x3a   :  { %1974 = vmatpush3.bf16.msra.mxu0 %v2458_v1  ;;  %1994 = vmatpush3.bf16.msra.mxu1 %v2466_v4  ;;  %v2463_v9 = vld [vmem:[#allocation5 + $0x28] sm:$0xff]   ;;  %v2469_v10 = vld [vmem:[#allocation5 + $0x58] sm:$0xff]   ;;  %v2464_v11 = vld [vmem:[#allocation5 + $0x30] sm:$0xff]   ;;  %s1525_s23 = sshll.u32 %s2620_s2, 4  ;;  %s1526_s23 = int_to_ptr.vmem [resolvable:$true] %s1525_s23 }
  0x3b   :  { %1975 = vmatprep.subr.bf16.mxu0 %v2617_v0  ;;  %1995 = vmatprep.subr.bf16.mxu1 %v2617_v0  ;;  %v2470_v12 = vld [vmem:[#allocation5 + $0x60] sm:$0xff]   ;;  %v2465_v13 = vld [vmem:[#allocation5 + $0x38] sm:$0xff]   ;;  %v2471_v15 = vld [vmem:[#allocation5 + $0x68] sm:$0xff]   ;;  %v2703_v21 = vsub.s32 0, %v2700_v20  ;;  %s2582_s24 = scalar_lea.vmem %s1526_s23, 32  ;;  %p2587_p11 = scmp.lt.s32.totalorder %s1526_s23, %s1526_s23 }
  0x3c   :  { %v57_v14 = vld [vmem:[#allocation2] sm:$0x3]  ;;  %v2472_v17 = vld [vmem:[#allocation5 + $0x70] sm:$0xff]   ;;  %v2705_v22 = vld [vmem:[#allocation7] sm:$0xff]  ;;  %p2583_p10 = scmp.ne.s32.totalorder %s1526_s23, %s2582_s24  ;;  %p2588_p12 = scmp.lt.s32.totalorder %s2582_s24, %s2582_s24 }
  0x3d   :  { %v58_v16 = vpack.c.bf16 %v57_v14, %v57_v14  ;;  %v2473_v18 = vld [vmem:[#allocation5 + $0x78] sm:$0xff]   ;;  %v78_v23 = vrot.slane %v2705_v22, %v2703_v21  ;;  %v2474_v31 = vld [vmem:[#allocation5 + $0x80] sm:$0xff]   ;;  %v2475_v32 = vld [vmem:[#allocation5 + $0x88] sm:$0xff]  }
  0x3e   :  { %1976 = vmatpush3.bf16.msra.mxu0 %v2459_v2  ;;  %1996 = vmatpush3.bf16.msra.mxu1 %v2467_v6  ;;  %v2476_v33 = vld [vmem:[#allocation5 + $0x90] sm:$0xff]   ;;  %v2477_v34 = vld [vmem:[#allocation5 + $0x98] sm:$0xff]   ;;  %v2478_v35 = vld [vmem:[#allocation5 + $0xa0] sm:$0xff]   ;;  %p2589_p13 = por %p2588_p12, %p2587_p11 }
  0x3f   :  { %1977 = vmatprep.subr.bf16.mxu0 %v2617_v0  ;;  %1997 = vmatprep.subr.bf16.mxu1 %v2617_v0  ;;  %v2479_v36 = vld [vmem:[#allocation5 + $0xa8] sm:$0xff]   ;;  %v2480_v37 = vld [vmem:[#allocation5 + $0xb0] sm:$0xff]   ;;  %v2481_v38 = vld [vmem:[#allocation5 + $0xb8] sm:$0xff]  }
  0x40   :  { %v1584_v39 = vld [vmem:[#allocation5 + $0x180] sm:$0xff]   ;;  %v1775_v41 = vld [vmem:[#allocation5 + $0x188] sm:$0xff]   ;;  %v1776_v42 = vld [vmem:[#allocation5 + $0x190] sm:$0xff]   ;;  %p2590_p0 = pnand %p2589_p13, %p2583_p10 }
  0x41   :  { %v1777_v43 = vld [vmem:[#allocation5 + $0x198] sm:$0xff]   ;;  %v1778_v19 = vld [vmem:[#allocation5 + $0x1a0] sm:$0xff]  }
  0x42   :  { %1978 = vmatpush3.bf16.msra.mxu0 %v2460_v3  ;;  %1998 = vmatpush3.bf16.msra.mxu1 %v2468_v8  ;;  %v305_v8 = vsub.s32 2, %v2700_v20 }
  0x43   :  { %1979 = vmatprep.subr.bf16.mxu0 %v2617_v0  ;;  %1999 = vmatprep.subr.bf16.mxu1 %v2617_v0 }
  0x46   :  { %1980 = vmatpush3.bf16.msra.mxu0 %v2461_v5  ;;  %2000 = vmatpush3.bf16.msra.mxu1 %v2469_v10 }
  0x47   :  { %1981 = vmatprep.subr.bf16.mxu0 %v2617_v0  ;;  %2001 = vmatprep.subr.bf16.mxu1 %v2617_v0 }
  0x4a   :  { %1982 = vmatpush3.bf16.msra.mxu0 %v2462_v7  ;;  %2002 = vmatpush3.bf16.msra.mxu1 %v2470_v12  ;;  %v310_v12 = vsub.s32 3, %v2700_v20 }
  0x4b   :  { %1983 = vmatprep.subr.bf16.mxu0 %v2617_v0  ;;  %2003 = vmatprep.subr.bf16.mxu1 %v2617_v0 }
  0x4e   :  { %1984 = vmatpush3.bf16.msra.mxu0 %v2463_v9  ;;  %2004 = vmatpush3.bf16.msra.mxu1 %v2471_v15 }
  0x4f   :  { %1985 = vmatprep.subr.bf16.mxu0 %v2617_v0  ;;  %2005 = vmatprep.subr.bf16.mxu1 %v2617_v0 }
  0x52   :  { %1986 = vmatpush3.bf16.msra.mxu0 %v2464_v11  ;;  %2006 = vmatpush3.bf16.msra.mxu1 %v2472_v17 }
  0x53   :  { %1987 = vmatprep.subr.bf16.mxu0 %v2617_v0  ;;  %2007 = vmatprep.subr.bf16.mxu1 %v2617_v0 }
  0x56   :  { %1988 = vmatpush3.bf16.msra.mxu0 %v2465_v13  ;;  %2008 = vmatpush3.bf16.msra.mxu1 %v2473_v18 }
  0x57   :  { %2013 = vmatprep.subr.bf16.mxu0 %v2617_v0  ;;  %2303 = vmatprep.subr.bf16.mxu1 %v2619_v40 }
  0x59   :  { %1990 = vmatmul.mubr.bf16.vlgmr.msra.gmra.mrb[0].mxu0 %v58_v16 }
  0x5a   :  { %2029 = vmatprep.mubr.msk.bf16.mxu0 %vm2618_vm0, %v2617_v0  ;;  %2014 = vmatpush3.bf16.msra.mxu0 %v2474_v31 }
  0x5b   :  { %2015 = vmatprep.subr.bf16.mxu0 %v2617_v0 }
  0x5e   :  { %2016 = vmatpush3.bf16.msra.mxu0 %v2475_v32 }
  0x5f   :  { %2017 = vmatprep.subr.bf16.mxu0 %v2617_v0 }
  0x62   :  { %2018 = vmatpush3.bf16.msra.mxu0 %v2476_v33 }
  0x63   :  { %2019 = vmatprep.subr.bf16.mxu0 %v2617_v0 }
  0x66   :  { %2020 = vmatpush3.bf16.msra.mxu0 %v2477_v34 }
  0x67   :  { %2021 = vmatprep.subr.bf16.mxu0 %v2617_v0 }
  0x6a   :  { %2022 = vmatpush3.bf16.msra.mxu0 %v2478_v35 }
  0x6b   :  { %2023 = vmatprep.subr.bf16.mxu0 %v2617_v0 }
  0x6e   :  { %2024 = vmatpush3.bf16.msra.mxu0 %v2479_v36 }
  0x6f   :  { %2025 = vmatprep.subr.bf16.mxu0 %v2617_v0 }
  0x72   :  { %2026 = vmatpush3.bf16.msra.mxu0 %v2480_v37 }
  0x73   :  { %2027 = vmatprep.subr.bf16.mxu0 %v2617_v0 }
  0x76   :  { %2028 = vmatpush3.bf16.msra.mxu0 %v2481_v38 }
  0x77   :  { %2327 = vmatprep.subr.bf16.mxu0 %v2619_v40 }
 0x12c   :  { %v161_v24 = vpop.f32.mrb[0].mxu0 }
 0x12d   :  { %v162_v25 = vadd.f32 %v161_v24, %v78_v23  ;;  %v1991_v26 = vpop.f32.mrb[1].mxu0  ;;  %v1779_v23 = vld [vmem:[#allocation5 + $0x1a8] sm:$0xff]   ;;  %v1780_v24 = vld [vmem:[#allocation5 + $0x1b0] sm:$0xff]  }
 0x12e   :  { %v164_v27 = vpop.f32.mrb[2].mxu0 }
 0x12f   :  { %v167_v28 = vmax.f32 %v162_v25, 0.0  ;;  %v1992_v29 = vpop.f32.mrb[3].mxu0  ;;  %v1781_v25 = vld [vmem:[#allocation5 + $0x1b8] sm:$0xff]  }
 0x131   :  { %v168_v30 = vpack.c.bf16 %v167_v28, %v167_v28 }
 0x133   :  { %2010 = vmatmul.mubr.bf16.vlgmr.msra.gmra.mrb[0].mxu1 %v168_v30 }
 0x134   :  { %2065 = vmatprep.mubr.msk.f32.mxu1 %vm2618_vm0, %v2617_v0  ;;  %2305 = vmatpush3.bf16.msra.mxu1 %v1584_v39 }
 0x135   :  { %2306 = vmatprep.subr.bf16.mxu1 %v2619_v40 }
 0x138   :  { %2308 = vmatpush3.bf16.msra.mxu1 %v1775_v41 }
 0x139   :  { %2309 = vmatprep.subr.bf16.mxu1 %v2619_v40 }
 0x13c   :  { %2311 = vmatpush3.bf16.msra.mxu1 %v1776_v42 }
 0x13d   :  { %2312 = vmatprep.subr.bf16.mxu1 %v2619_v40 }
 0x140   :  { %2314 = vmatpush3.bf16.msra.mxu1 %v1777_v43 }
 0x141   :  { %2315 = vmatprep.subr.bf16.mxu1 %v2619_v40 }
 0x144   :  { %2317 = vmatpush3.bf16.msra.mxu1 %v1778_v19  ;;  %v1789_v19 = vld [vmem:[#allocation5 + $0x208] sm:$0xff]  }
 0x145   :  { %2318 = vmatprep.subr.bf16.mxu1 %v2619_v40 }
 0x148   :  { %2320 = vmatpush3.bf16.msra.mxu1 %v1779_v23  ;;  %v1790_v23 = vld [vmem:[#allocation5 + $0x210] sm:$0xff]  }
 0x149   :  { %2321 = vmatprep.subr.bf16.mxu1 %v2619_v40 }
 0x14c   :  { %2323 = vmatpush3.bf16.msra.mxu1 %v1780_v24  ;;  %v1791_v24 = vld [vmem:[#allocation5 + $0x218] sm:$0xff]  }
 0x14d   :  { %2324 = vmatprep.subr.bf16.mxu1 %v2619_v40 }
 0x150   :  { %2326 = vmatpush3.bf16.msra.mxu1 %v1781_v25  ;;  %v2772_v25 = vsub.s32 1, %v2700_v20  ;;  %v1793_v20 = vld [vmem:[#allocation5 + $0x228] sm:$0xff]  }
 0x151   :  { %2103 = vmatprep.subr.bf16.mxu1 %v2617_v0 }
 0x206   :  { %v268_v44 = vpop.f32.mrb[0].mxu1 }
 0x207   :  { %v275_v45 = vsel %vm274_vm1, %v268_v44, 0.0  ;;  %v283_v46 = vmul.f32 %v268_v44, %v268_v44  ;;  %v2011_v47 = vpop.f32.mrb[1].mxu1 }
 0x208   :  { %v276_v48 = vrot.slane %v275_v45, 4  ;;  %v271_v49 = vpop.f32.mrb[2].mxu1  ;;  %v1616_v47 = vld [vmem:[#allocation5 + $0x1c0] sm:$0xff]  }
 0x209   :  { %v284_v50 = vsel %vm274_vm1, %v283_v46, 0.0  ;;  %v2012_v51 = vpop.f32.mrb[3].mxu1  ;;  %v1783_v49 = vld [vmem:[#allocation5 + $0x1d0] sm:$0xff]  }
 0x20a   :  { %v277_v52 = vadd.f32 %v276_v48, %v275_v45  ;;  %v285_v53 = vrot.slane %v284_v50, 4  ;;  %v1782_v48 = vld [vmem:[#allocation5 + $0x1c8] sm:$0xff]   ;;  %v1785_v51 = vld [vmem:[#allocation5 + $0x1e0] sm:$0xff]  }
 0x20c   :  { %v278_v54 = vrot.slane %v277_v52, 2  ;;  %v286_v55 = vadd.f32 %v285_v53, %v284_v50  ;;  %v1784_v50 = vld [vmem:[#allocation5 + $0x1d8] sm:$0xff]   ;;  %v1787_v53 = vld [vmem:[#allocation5 + $0x1f0] sm:$0xff]  }
 0x20e   :  { %v279_v56 = vadd.f32 %v278_v54, %v277_v52  ;;  %v287_v57 = vrot.slane %v286_v55, 2  ;;  %v1786_v52 = vld [vmem:[#allocation5 + $0x1e8] sm:$0xff]   ;;  %v1788_v54 = vld [vmem:[#allocation5 + $0x1f8] sm:$0xff]  }
 0x210   :  { %v280_v58 = vrot.slane %v279_v56, 1  ;;  %v288_v59 = vadd.f32 %v287_v57, %v286_v55  ;;  %v2482_v55 = vld [vmem:[#allocation5 + $0xc0] sm:$0xff]   ;;  %v2484_v57 = vld [vmem:[#allocation5 + $0xd0] sm:$0xff]  }
 0x212   :  { %v281_v60 = vadd.f32 %v280_v58, %v279_v56  ;;  %v289_v61 = vrot.slane %v288_v59, 1  ;;  %v2483_v56 = vld [vmem:[#allocation5 + $0xc8] sm:$0xff]   ;;  %v2485_v58 = vld [vmem:[#allocation5 + $0xd8] sm:$0xff]  }
 0x214   :  { %v282_v62 = vmul.f32 0.5, %v281_v60  ;;  %v290_v63 = vadd.f32 %v289_v61, %v288_v59  ;;  %v2486_v59 = vld [vmem:[#allocation5 + $0xe0] sm:$0xff]  }
 0x216   :  { %v291_v1 = vmul.f32 0.5, %v290_v63  ;;  %v292_v2 = vmul.f32 %v282_v62, %v282_v62 }
 0x218   :  { %v293_v3 = vsub.f32 %v291_v1, %v292_v2 }
 0x21a   :  { %v294_v4 = vmax.f32 %v293_v3, 0.0 }
 0x21c   :  { %v295_v5 = vadd.f32 1e-05, %v294_v4 }
 0x21e   :  { %2506 = vrsqrt.f32 %v295_v5 }
 0x228   :  { %v2507_v6 = vpop.eup %2506 }
 0x229   :  { %v297_v7 = vmul.f32 %v2507_v6, %v2705_v22 }
 0x22b   :  { %v298_v9 = vmul.f32 %v297_v7, %v282_v62  ;;  %v306_v11 = vrot.slane %v297_v7, %v305_v8 }
 0x22d   :  { %v300_v10 = vrot.slane %v298_v9, 7  ;;  %v307_v14 = vmul.f32 %v306_v11, %v268_v44 }
 0x22f   :  { %v302_v13 = vsub.f32 %v2705_v22, %v300_v10 }
 0x231   :  { %v311_v15 = vrot.slane %v302_v13, %v310_v12 }
 0x233   :  { %v312_v16 = vadd.f32 %v311_v15, %v307_v14  ;;  %v2487_v15 = vld [vmem:[#allocation5 + $0xe8] sm:$0xff]  }
 0x235   :  { %v313_v17 = vmax.f32 %v312_v16, 0.0  ;;  %v2488_v16 = vld [vmem:[#allocation5 + $0xf0] sm:$0xff]  }
 0x237   :  { %v314_v18 = vpack.c.bf16 %v313_v17, %v313_v17  ;;  %v2489_v17 = vld [vmem:[#allocation5 + $0xf8] sm:$0xff]  }
 0x239   :  { %2030 = vmatmul.mubr.bf16.vlgmr.msra.gmra.mrb[4].mxu0 %v314_v18  ;;  %v1648_v18 = vld [vmem:[#allocation5 + $0x200] sm:$0xff]  }
 0x23a   :  { %2100 = vmatprep.mubr.msk.f32.mxu0 %vm2618_vm0, %v2617_v0  ;;  %2329 = vmatpush3.bf16.msra.mxu0 %v1616_v47 }
 0x23b   :  { %2330 = vmatprep.subr.bf16.mxu0 %v2619_v40 }
 0x23e   :  { %2332 = vmatpush3.bf16.msra.mxu0 %v1782_v48 }
 0x23f   :  { %2333 = vmatprep.subr.bf16.mxu0 %v2619_v40 }
 0x242   :  { %2335 = vmatpush3.bf16.msra.mxu0 %v1783_v49 }
 0x243   :  { %2336 = vmatprep.subr.bf16.mxu0 %v2619_v40 }
 0x246   :  { %2338 = vmatpush3.bf16.msra.mxu0 %v1784_v50 }
 0x247   :  { %2339 = vmatprep.subr.bf16.mxu0 %v2619_v40 }
 0x24a   :  { %2341 = vmatpush3.bf16.msra.mxu0 %v1785_v51 }
 0x24b   :  { %2342 = vmatprep.subr.bf16.mxu0 %v2619_v40 }
 0x24e   :  { %2344 = vmatpush3.bf16.msra.mxu0 %v1786_v52 }
 0x24f   :  { %2345 = vmatprep.subr.bf16.mxu0 %v2619_v40 }
 0x252   :  { %2347 = vmatpush3.bf16.msra.mxu0 %v1787_v53 }
 0x253   :  { %2348 = vmatprep.subr.bf16.mxu0 %v2619_v40 }
 0x256   :  { %2350 = vmatpush3.bf16.msra.mxu0 %v1788_v54 }
 0x257   :  { %2351 = vmatprep.subr.bf16.mxu0 %v2619_v40 }
 0x30c   :  { %v2736_v26 = vpop.f32.mrb[4].mxu0 }
 0x30d   :  { %v420_v27 = vsel %vm274_vm1, %v2736_v26, 0.0  ;;  %v427_v28 = vmul.f32 %v2736_v26, %v2736_v26  ;;  %v2031_v29 = vpop.f32.mrb[5].mxu0 }
 0x30e   :  { %v421_v30 = vrot.slane %v420_v27, 4  ;;  %v417_v31 = vpop.f32.mrb[6].mxu0 }
 0x30f   :  { %v428_v32 = vsel %vm274_vm1, %v427_v28, 0.0  ;;  %v2032_v33 = vpop.f32.mrb[7].mxu0 }
 0x310   :  { %v422_v34 = vadd.f32 %v421_v30, %v420_v27  ;;  %v429_v35 = vrot.slane %v428_v32, 4 }
 0x312   :  { %v423_v36 = vrot.slane %v422_v34, 2  ;;  %v430_v37 = vadd.f32 %v429_v35, %v428_v32  ;;  %v1792_v35 = vld [vmem:[#allocation5 + $0x220] sm:$0xff]  }
 0x314   :  { %v424_v38 = vadd.f32 %v423_v36, %v422_v34  ;;  %v431_v39 = vrot.slane %v430_v37, 2  ;;  %v1794_v36 = vld [vmem:[#allocation5 + $0x230] sm:$0xff]  }
 0x316   :  { %v425_v41 = vrot.slane %v424_v38, 1  ;;  %v432_v42 = vadd.f32 %v431_v39, %v430_v37 }
 0x318   :  { %v433_v43 = vrot.slane %v432_v42, 1  ;;  %v426_v44 = vadd.f32 %v425_v41, %v424_v38 }
 0x31a   :  { %v434_v45 = vadd.f32 %v433_v43, %v432_v42 }
 0x31c   :  { %v436_v46 = vsel %vm435_vm2, %v426_v44, %v434_v45 }
 0x31d   :  { %2066 = vmatmul.mubr.f32.vlgmr.msra.gmra.mrb[4].mxu1 %v436_v46 }
 0x31e   :  { %2119 = vmatprep.mubr.msk.bf16.mxu1 %vm2618_vm0, %v2617_v0  ;;  %2104 = vmatpush3.bf16.msra.mxu1 %v2482_v55 }
 0x31f   :  { %2105 = vmatprep.subr.bf16.mxu1 %v2617_v0 }
 0x322   :  { %2106 = vmatpush3.bf16.msra.mxu1 %v2483_v56 }
 0x323   :  { %2107 = vmatprep.subr.bf16.mxu1 %v2617_v0 }
 0x326   :  { %2108 = vmatpush3.bf16.msra.mxu1 %v2484_v57 }
 0x327   :  { %2109 = vmatprep.subr.bf16.mxu1 %v2617_v0 }
 0x32a   :  { %2110 = vmatpush3.bf16.msra.mxu1 %v2485_v58  ;;  %v1680_v58 = vld [vmem:[#allocation5 + $0x240] sm:$0xff]  }
 0x32b   :  { %2111 = vmatprep.subr.bf16.mxu1 %v2617_v0 }
 0x32e   :  { %2112 = vmatpush3.bf16.msra.mxu1 %v2486_v59  ;;  %v1796_v59 = vld [vmem:[#allocation5 + $0x248] sm:$0xff]  }
 0x32f   :  { %2113 = vmatprep.subr.bf16.mxu1 %v2617_v0 }
 0x332   :  { %2114 = vmatpush3.bf16.msra.mxu1 %v2487_v15 }
 0x333   :  { %2115 = vmatprep.subr.bf16.mxu1 %v2617_v0 }
 0x336   :  { %2116 = vmatpush3.bf16.msra.mxu1 %v2488_v16 }
 0x337   :  { %2117 = vmatprep.subr.bf16.mxu1 %v2617_v0 }
 0x33a   :  { %2118 = vmatpush3.bf16.msra.mxu1 %v2489_v17 }
 0x33b   :  { %2375 = vmatprep.subr.bf16.mxu1 %v2619_v40 }
 0x3f0   :  { %v536_v60 = vpop.f32.mrb[4].mxu1 }
 0x3f1   :  { %v540_v61 = vmul.f32 0.125, %v536_v60  ;;  %v2067_v62 = vpop.f32.mrb[5].mxu1  ;;  %v1797_v60 = vld [vmem:[#allocation5 + $0x250] sm:$0xff]  }
 0x3f2   :  { %v1799_v62 = vld [vmem:[#allocation5 + $0x260] sm:$0xff]  }
 0x3f3   :  { %v541_v63 = vmul.f32 %v540_v61, %v540_v61  ;;  %v554_v8 = vrot.slane %v540_v61, 4 }
 0x3f5   :  { %v543_v1 = vrot.slane %v541_v63, 7  ;;  %v1800_v63 = vld [vmem:[#allocation5 + $0x268] sm:$0xff]  }
 0x3f7   :  { %v545_v2 = vsub.f32 %v540_v61, %v543_v1  ;;  %v1798_v61 = vld [vmem:[#allocation5 + $0x258] sm:$0xff]   ;;  %v1801_v1 = vld [vmem:[#allocation5 + $0x270] sm:$0xff]  }
 0x3f9   :  { %v546_v3 = vmax.f32 %v545_v2, 0.0  ;;  %v1802_v2 = vld [vmem:[#allocation5 + $0x278] sm:$0xff]  }
 0x3fb   :  { %v547_v4 = vadd.f32 1e-05, %v546_v3  ;;  %v2490_v3 = vld [vmem:[#allocation5 + $0x100] sm:$0xff]  }
 0x3fd   :  { %2508 = vrsqrt.f32 %v547_v4  ;;  %v2491_v4 = vld [vmem:[#allocation5 + $0x108] sm:$0xff]  }
 0x407   :  { %v2509_v5 = vpop.eup %2508 }
 0x408   :  { %v550_v6 = vrot.slane %v2509_v5, 5  ;;  %v2492_v5 = vld [vmem:[#allocation5 + $0x110] sm:$0xff]  }
 0x40a   :  { %v552_v7 = vmul.f32 %v550_v6, %v2705_v22  ;;  %v2493_v6 = vld [vmem:[#allocation5 + $0x118] sm:$0xff]  }
 0x40c   :  { %v556_v9 = vmul.f32 %v554_v8, %v552_v7  ;;  %v562_v12 = vrot.slane %v552_v7, 4  ;;  %v2494_v7 = vld [vmem:[#allocation5 + $0x120] sm:$0xff]  }
 0x40e   :  { %v558_v10 = vrot.slane %v556_v9, 7 }
 0x410   :  { %v560_v11 = vsub.f32 %v2705_v22, %v558_v10 }
 0x412   :  { %v565_v13 = vrot.slane %v560_v11, 4 }
 0x414   :  { %v567_v14 = vsel %vm435_vm2, %v562_v12, %v565_v13 }
 0x415   :  { %2101 = vmatmul.mubr.f32.vlgmr.msra.gmra.mrb[8].mxu0 %v567_v14 }
 0x416   :  { %2155 = vmatprep.mubr.msk.f32.mxu0 %vm2618_vm0, %v2617_v0  ;;  %2353 = vmatpush3.bf16.msra.mxu0 %v1648_v18 }
 0x417   :  { %2354 = vmatprep.subr.bf16.mxu0 %v2619_v40 }
 0x41a   :  { %2356 = vmatpush3.bf16.msra.mxu0 %v1789_v19 }
 0x41b   :  { %2357 = vmatprep.subr.bf16.mxu0 %v2619_v40 }
 0x41e   :  { %2359 = vmatpush3.bf16.msra.mxu0 %v1790_v23 }
 0x41f   :  { %2360 = vmatprep.subr.bf16.mxu0 %v2619_v40 }
 0x422   :  { %2362 = vmatpush3.bf16.msra.mxu0 %v1791_v24 }
 0x423   :  { %2363 = vmatprep.subr.bf16.mxu0 %v2619_v40 }
 0x426   :  { %2365 = vmatpush3.bf16.msra.mxu0 %v1792_v35  ;;  %v1803_v35 = vld [vmem:[#allocation5 + $0x288] sm:$0xff]  }
 0x427   :  { %2366 = vmatprep.subr.bf16.mxu0 %v2619_v40 }
 0x42a   :  { %2368 = vmatpush3.bf16.msra.mxu0 %v1793_v20  ;;  %v1804_v20 = vld [vmem:[#allocation5 + $0x290] sm:$0xff]  }
 0x42b   :  { %2369 = vmatprep.subr.bf16.mxu0 %v2619_v40 }
 0x42e   :  { %2371 = vmatpush3.bf16.msra.mxu0 %v1794_v36  ;;  %v1805_v36 = vld [vmem:[#allocation5 + $0x298] sm:$0xff]  }
 0x42f   :  { %2372 = vmatprep.subr.bf16.mxu0 %v2619_v40 }
 0x4e8   :  { %v667_v27 = vpop.f32.mrb[8].mxu0 }
 0x4e9   :  { %v674_v28 = vrot.slane %v667_v27, %v2703_v21  ;;  %v2102_v29 = vpop.f32.mrb[9].mxu0  ;;  %v679_v31 = vrot.slane %v667_v27, %v2772_v25 }
 0x4eb   :  { %v675_v30 = vmul.f32 %v674_v28, %v2736_v26  ;;  %v1795_v26 = vld [vmem:[#allocation5 + $0x238] sm:$0xff]  }
 0x4ec   :  { %2374 = vmatpush3.bf16.msra.mxu0 %v1795_v26 }
 0x4ed   :  { %v680_v32 = vadd.f32 %v679_v31, %v675_v30  ;;  %2193 = vmatprep.subr.bf16.mxu0 %v2617_v0  ;;  %v2495_v31 = vld [vmem:[#allocation5 + $0x128] sm:$0xff]  }
 0x4ef   :  { %v681_v33 = vmax.f32 %v680_v32, 0.0  ;;  %v2496_v32 = vld [vmem:[#allocation5 + $0x130] sm:$0xff]  }
 0x4f1   :  { %v682_v34 = vpack.c.bf16 %v681_v33, %v681_v33  ;;  %v2497_v33 = vld [vmem:[#allocation5 + $0x138] sm:$0xff]  }
 0x4f3   :  { %2120 = vmatmul.mubr.bf16.vlgmr.msra.gmra.mrb[8].mxu1 %v682_v34  ;;  %v1712_v34 = vld [vmem:[#allocation5 + $0x280] sm:$0xff]  }
 0x4f4   :  { %2190 = vmatprep.mubr.msk.f32.mxu1 %vm2618_vm0, %v2617_v0  ;;  %2377 = vmatpush3.bf16.msra.mxu1 %v1680_v58 }
 0x4f5   :  { %2378 = vmatprep.subr.bf16.mxu1 %v2619_v40 }
 0x4f8   :  { %2380 = vmatpush3.bf16.msra.mxu1 %v1796_v59 }
 0x4f9   :  { %2381 = vmatprep.subr.bf16.mxu1 %v2619_v40 }
 0x4fc   :  { %2383 = vmatpush3.bf16.msra.mxu1 %v1797_v60 }
 0x4fd   :  { %2384 = vmatprep.subr.bf16.mxu1 %v2619_v40 }
 0x500   :  { %2386 = vmatpush3.bf16.msra.mxu1 %v1798_v61 }
 0x501   :  { %2387 = vmatprep.subr.bf16.mxu1 %v2619_v40 }
 0x504   :  { %2389 = vmatpush3.bf16.msra.mxu1 %v1799_v62 }
 0x505   :  { %2390 = vmatprep.subr.bf16.mxu1 %v2619_v40 }
 0x508   :  { %2392 = vmatpush3.bf16.msra.mxu1 %v1800_v63 }
 0x509   :  { %2393 = vmatprep.subr.bf16.mxu1 %v2619_v40 }
 0x50c   :  { %2395 = vmatpush3.bf16.msra.mxu1 %v1801_v1 }
 0x50d   :  { %2396 = vmatprep.subr.bf16.mxu1 %v2619_v40 }
 0x510   :  { %2398 = vmatpush3.bf16.msra.mxu1 %v1802_v2 }
 0x511   :  { %2399 = vmatprep.subr.bf16.mxu1 %v2619_v40 }
 0x5c6   :  { %v2783_v37 = vpop.f32.mrb[8].mxu1 }
 0x5c7   :  { %v788_v38 = vsel %vm274_vm1, %v2783_v37, 0.0  ;;  %v795_v39 = vmul.f32 %v2783_v37, %v2783_v37  ;;  %v2121_v41 = vpop.f32.mrb[9].mxu1 }
 0x5c8   :  { %v789_v42 = vrot.slane %v788_v38, 4  ;;  %v785_v43 = vpop.f32.mrb[10].mxu1 }
 0x5c9   :  { %v796_v44 = vsel %vm274_vm1, %v795_v39, 0.0  ;;  %v2122_v45 = vpop.f32.mrb[11].mxu1 }
 0x5ca   :  { %v790_v46 = vadd.f32 %v789_v42, %v788_v38  ;;  %v797_v47 = vrot.slane %v796_v44, 4 }
 0x5cc   :  { %v791_v48 = vrot.slane %v790_v46, 2  ;;  %v798_v49 = vadd.f32 %v797_v47, %v796_v44  ;;  %v1807_v47 = vld [vmem:[#allocation5 + $0x2a8] sm:$0xff]  }
 0x5ce   :  { %v792_v50 = vadd.f32 %v791_v48, %v790_v46  ;;  %v799_v51 = vrot.slane %v798_v49, 2  ;;  %v1806_v46 = vld [vmem:[#allocation5 + $0x2a0] sm:$0xff]   ;;  %v1808_v48 = vld [vmem:[#allocation5 + $0x2b0] sm:$0xff]  }
 0x5d0   :  { %v793_v52 = vrot.slane %v792_v50, 1  ;;  %v800_v53 = vadd.f32 %v799_v51, %v798_v49 }
 0x5d2   :  { %v801_v54 = vrot.slane %v800_v53, 1  ;;  %v794_v55 = vadd.f32 %v793_v52, %v792_v50 }
 0x5d4   :  { %v802_v56 = vadd.f32 %v801_v54, %v800_v53 }
 0x5d6   :  { %v803_v57 = vsel %vm435_vm2, %v794_v55, %v802_v56 }
 0x5d7   :  { %2156 = vmatmul.mubr.f32.vlgmr.msra.gmra.mrb[10].mxu0 %v803_v57 }
 0x5d8   :  { %2209 = vmatprep.mubr.msk.bf16.mxu0 %vm2618_vm0, %v2617_v0  ;;  %2194 = vmatpush3.bf16.msra.mxu0 %v2490_v3 }
 0x5d9   :  { %2195 = vmatprep.subr.bf16.mxu0 %v2617_v0 }
 0x5dc   :  { %2196 = vmatpush3.bf16.msra.mxu0 %v2491_v4 }
 0x5dd   :  { %2197 = vmatprep.subr.bf16.mxu0 %v2617_v0 }
 0x5e0   :  { %2198 = vmatpush3.bf16.msra.mxu0 %v2492_v5 }
 0x5e1   :  { %2199 = vmatprep.subr.bf16.mxu0 %v2617_v0 }
 0x5e4   :  { %2200 = vmatpush3.bf16.msra.mxu0 %v2493_v6  ;;  %v1744_v6 = vld [vmem:[#allocation5 + $0x2c0] sm:$0xff]  }
 0x5e5   :  { %2201 = vmatprep.subr.bf16.mxu0 %v2617_v0 }
 0x5e8   :  { %2202 = vmatpush3.bf16.msra.mxu0 %v2494_v7  ;;  %v1810_v7 = vld [vmem:[#allocation5 + $0x2c8] sm:$0xff]  }
 0x5e9   :  { %2203 = vmatprep.subr.bf16.mxu0 %v2617_v0 }
 0x5ec   :  { %2204 = vmatpush3.bf16.msra.mxu0 %v2495_v31 }
 0x5ed   :  { %2205 = vmatprep.subr.bf16.mxu0 %v2617_v0 }
 0x5f0   :  { %2206 = vmatpush3.bf16.msra.mxu0 %v2496_v32  ;;  %v56_v32 = vld [vmem:[#allocation7 + $0x8] sm:$0xff] }
 0x5f1   :  { %2207 = vmatprep.subr.bf16.mxu0 %v2617_v0 }
 0x5f4   :  { %2208 = vmatpush3.bf16.msra.mxu0 %v2497_v33 }
 0x5f5   :  { %2423 = vmatprep.subr.bf16.mxu0 %v2619_v40 }
 0x6aa   :  { %v903_v8 = vpop.f32.mrb[10].mxu0 }
 0x6ab   :  { %v907_v9 = vmul.f32 0.03125, %v903_v8  ;;  %v2157_v10 = vpop.f32.mrb[11].mxu0  ;;  %v1811_v8 = vld [vmem:[#allocation5 + $0x2d0] sm:$0xff]  }
 0x6ac   :  { %v1813_v10 = vld [vmem:[#allocation5 + $0x2e0] sm:$0xff]  }
 0x6ad   :  { %v908_v11 = vmul.f32 %v907_v9, %v907_v9  ;;  %v921_v19 = vrot.slane %v907_v9, 2 }
 0x6af   :  { %v910_v12 = vrot.slane %v908_v11, 7  ;;  %v1814_v11 = vld [vmem:[#allocation5 + $0x2e8] sm:$0xff]  }
 0x6b1   :  { %v912_v13 = vsub.f32 %v907_v9, %v910_v12  ;;  %v1812_v9 = vld [vmem:[#allocation5 + $0x2d8] sm:$0xff]   ;;  %v1815_v12 = vld [vmem:[#allocation5 + $0x2f0] sm:$0xff]  }
 0x6b3   :  { %v913_v14 = vmax.f32 %v912_v13, 0.0  ;;  %v1816_v13 = vld [vmem:[#allocation5 + $0x2f8] sm:$0xff]  }
 0x6b5   :  { %v914_v15 = vadd.f32 1e-05, %v913_v14  ;;  %v2498_v14 = vld [vmem:[#allocation5 + $0x140] sm:$0xff]  }
 0x6b7   :  { %2510 = vrsqrt.f32 %v914_v15  ;;  %v2499_v15 = vld [vmem:[#allocation5 + $0x148] sm:$0xff]  }
 0x6c1   :  { %v2511_v16 = vpop.eup %2510 }
 0x6c2   :  { %v917_v17 = vrot.slane %v2511_v16, 3  ;;  %v2500_v16 = vld [vmem:[#allocation5 + $0x150] sm:$0xff]  }
 0x6c4   :  { %v919_v18 = vmul.f32 %v917_v17, %v2705_v22  ;;  %v2501_v17 = vld [vmem:[#allocation5 + $0x158] sm:$0xff]  }
 0x6c6   :  { %v923_v23 = vmul.f32 %v921_v19, %v919_v18  ;;  %v929_v28 = vrot.slane %v919_v18, 6  ;;  %v2502_v18 = vld [vmem:[#allocation5 + $0x160] sm:$0xff]  }
 0x6c8   :  { %v925_v24 = vrot.slane %v923_v23, 7 }
 0x6ca   :  { %v927_v27 = vsub.f32 %v2705_v22, %v925_v24 }
 0x6cc   :  { %v932_v29 = vrot.slane %v927_v27, 6 }
 0x6ce   :  { %v934_v30 = vsel %vm435_vm2, %v929_v28, %v932_v29 }
 0x6cf   :  { %2191 = vmatmul.mubr.f32.vlgmr.msra.gmra.mrb[6].mxu1 %v934_v30 }
 0x6d0   :  { %2245 = vmatprep.mubr.msk.f32.mxu1 %vm2618_vm0, %v2617_v0  ;;  %2401 = vmatpush3.bf16.msra.mxu1 %v1712_v34 }
 0x6d1   :  { %2402 = vmatprep.subr.bf16.mxu1 %v2619_v40 }
 0x6d4   :  { %2404 = vmatpush3.bf16.msra.mxu1 %v1803_v35 }
 0x6d5   :  { %2405 = vmatprep.subr.bf16.mxu1 %v2619_v40 }
 0x6d8   :  { %2407 = vmatpush3.bf16.msra.mxu1 %v1804_v20 }
 0x6d9   :  { %2408 = vmatprep.subr.bf16.mxu1 %v2619_v40 }
 0x6dc   :  { %2410 = vmatpush3.bf16.msra.mxu1 %v1805_v36 }
 0x6dd   :  { %2411 = vmatprep.subr.bf16.mxu1 %v2619_v40 }
 0x6e0   :  { %2413 = vmatpush3.bf16.msra.mxu1 %v1806_v46 }
 0x6e1   :  { %2414 = vmatprep.subr.bf16.mxu1 %v2619_v40 }
 0x6e4   :  { %2416 = vmatpush3.bf16.msra.mxu1 %v1807_v47 }
 0x6e5   :  { %2417 = vmatprep.subr.bf16.mxu1 %v2619_v40 }
 0x6e8   :  { %2419 = vmatpush3.bf16.msra.mxu1 %v1808_v48 }
 0x6e9   :  { %2420 = vmatprep.subr.bf16.mxu1 %v2619_v40 }
 0x7a2   :  { %v1034_v26 = vpop.f32.mrb[6].mxu1 }
 0x7a3   :  { %v1041_v38 = vrot.slane %v1034_v26, %v2703_v21  ;;  %v2192_v39 = vpop.f32.mrb[7].mxu1  ;;  %v1046_v42 = vrot.slane %v1034_v26, %v2772_v25 }
 0x7a4   :  { %v2504_v39 = vld [vmem:[#allocation5 + $0x170] sm:$0xff]  }
 0x7a5   :  { %v1042_v41 = vmul.f32 %v1041_v38, %v2783_v37  ;;  %v1809_v37 = vld [vmem:[#allocation5 + $0x2b8] sm:$0xff]   ;;  %v2503_v38 = vld [vmem:[#allocation5 + $0x168] sm:$0xff]  }
 0x7a6   :  { %2422 = vmatpush3.bf16.msra.mxu1 %v1809_v37 }
 0x7a7   :  { %v1047_v43 = vadd.f32 %v1046_v42, %v1042_v41  ;;  %2283 = vmatprep.subr.bf16.mxu1 %v2617_v0  ;;  %v2505_v41 = vld [vmem:[#allocation5 + $0x178] sm:$0xff]  }
 0x7a9   :  { %v1048_v44 = vmax.f32 %v1047_v43, 0.0 }
 0x7ab   :  { %v1049_v45 = vpack.c.bf16 %v1048_v44, %v1048_v44 }
 0x7ad   :  { %2210 = vmatmul.mubr.bf16.vlgmr.msra.gmra.mrb[12].mxu0 %v1049_v45 }
 0x7ae   :  { %2280 = vmatprep.mubr.msk.f32.mxu0 %vm2618_vm0, %v2617_v0  ;;  %2425 = vmatpush3.bf16.msra.mxu0 %v1744_v6 }
 0x7af   :  { %2426 = vmatprep.subr.bf16.mxu0 %v2619_v40 }
 0x7b2   :  { %2428 = vmatpush3.bf16.msra.mxu0 %v1810_v7 }
 0x7b3   :  { %2429 = vmatprep.subr.bf16.mxu0 %v2619_v40 }
 0x7b6   :  { %2431 = vmatpush3.bf16.msra.mxu0 %v1811_v8 }
 0x7b7   :  { %2432 = vmatprep.subr.bf16.mxu0 %v2619_v40 }
 0x7ba   :  { %2434 = vmatpush3.bf16.msra.mxu0 %v1812_v9 }
 0x7bb   :  { %2435 = vmatprep.subr.bf16.mxu0 %v2619_v40 }
 0x7be   :  { %2437 = vmatpush3.bf16.msra.mxu0 %v1813_v10 }
 0x7bf   :  { %2438 = vmatprep.subr.bf16.mxu0 %v2619_v40 }
 0x7c2   :  { %2440 = vmatpush3.bf16.msra.mxu0 %v1814_v11 }
 0x7c3   :  { %2441 = vmatprep.subr.bf16.mxu0 %v2619_v40 }
 0x7c6   :  { %2443 = vmatpush3.bf16.msra.mxu0 %v1815_v12 }
 0x7c7   :  { %2444 = vmatprep.subr.bf16.mxu0 %v2619_v40 }
 0x7ca   :  { %2446 = vmatpush3.bf16.msra.mxu0 %v1816_v13 }
 0x880   :  { %v2827_v49 = vpop.f32.mrb[12].mxu0 }
 0x881   :  { %v1155_v50 = vsel %vm274_vm1, %v2827_v49, 0.0  ;;  %v1162_v51 = vmul.f32 %v2827_v49, %v2827_v49  ;;  %v2211_v52 = vpop.f32.mrb[13].mxu0 }
 0x882   :  { %v1156_v53 = vrot.slane %v1155_v50, 4  ;;  %v1152_v54 = vpop.f32.mrb[14].mxu0 }
 0x883   :  { %v1163_v55 = vsel %vm274_vm1, %v1162_v51, 0.0  ;;  %v2212_v56 = vpop.f32.mrb[15].mxu0 }
 0x884   :  { %v1157_v57 = vadd.f32 %v1156_v53, %v1155_v50  ;;  %v1164_v58 = vrot.slane %v1163_v55, 4  ;;  %v1428_v50 = vrot.slane %v2705_v22, %v2772_v25 }
 0x886   :  { %v1158_v59 = vrot.slane %v1157_v57, 2  ;;  %v1165_v60 = vadd.f32 %v1164_v58, %v1163_v55 }
 0x888   :  { %v1159_v61 = vadd.f32 %v1158_v59, %v1157_v57  ;;  %v1166_v62 = vrot.slane %v1165_v60, 2 }
 0x88a   :  { %v1160_v63 = vrot.slane %v1159_v61, 1  ;;  %v1167_v1 = vadd.f32 %v1166_v62, %v1165_v60 }
 0x88c   :  { %v1168_v2 = vrot.slane %v1167_v1, 1  ;;  %v1161_v3 = vadd.f32 %v1160_v63, %v1159_v61 }
 0x88e   :  { %v1169_v4 = vadd.f32 %v1168_v2, %v1167_v1 }
 0x890   :  { %v1170_v5 = vsel %vm435_vm2, %v1161_v3, %v1169_v4 }
 0x891   :  { %2246 = vmatmul.mubr.f32.vlgmr.msra.gmra.mrb[12].mxu1 %v1170_v5 }
 0x892   :  { %2299 = vmatprep.mubr.msk.bf16.mxu1 %vm2618_vm0, %v2617_v0  ;;  %2284 = vmatpush3.bf16.msra.mxu1 %v2498_v14 }
 0x893   :  { %2285 = vmatprep.subr.bf16.mxu1 %v2617_v0 }
 0x896   :  { %2286 = vmatpush3.bf16.msra.mxu1 %v2499_v15 }
 0x897   :  { %2287 = vmatprep.subr.bf16.mxu1 %v2617_v0 }
 0x89a   :  { %2288 = vmatpush3.bf16.msra.mxu1 %v2500_v16 }
 0x89b   :  { %2289 = vmatprep.subr.bf16.mxu1 %v2617_v0 }
 0x89e   :  { %2290 = vmatpush3.bf16.msra.mxu1 %v2501_v17 }
 0x89f   :  { %2291 = vmatprep.subr.bf16.mxu1 %v2617_v0 }
 0x8a2   :  { %2292 = vmatpush3.bf16.msra.mxu1 %v2502_v18 }
 0x8a3   :  { %2293 = vmatprep.subr.bf16.mxu1 %v2617_v0 }
 0x8a6   :  { %2294 = vmatpush3.bf16.msra.mxu1 %v2503_v38 }
 0x8a7   :  { %2295 = vmatprep.subr.bf16.mxu1 %v2617_v0 }
 0x8aa   :  { %2296 = vmatpush3.bf16.msra.mxu1 %v2504_v39 }
 0x8ab   :  { %2297 = vmatprep.subr.bf16.mxu1 %v2617_v0 }
 0x8ae   :  { %2298 = vmatpush3.bf16.msra.mxu1 %v2505_v41 }
 0x964   :  { %v1270_v40 = vpop.f32.mrb[12].mxu1 }
 0x965   :  { %v1274_v19 = vmul.f32 0.014705882, %v1270_v40  ;;  %v2247_v23 = vpop.f32.mrb[13].mxu1 }
 0x967   :  { %v1275_v24 = vmul.f32 %v1274_v19, %v1274_v19 }
 0x969   :  { %v1277_v27 = vrot.slane %v1275_v24, 7 }
 0x96b   :  { %v1279_v28 = vsub.f32 %v1274_v19, %v1277_v27 }
 0x96d   :  { %v1280_v29 = vmax.f32 %v1279_v28, 0.0 }
 0x96f   :  { %v1281_v30 = vadd.f32 1e-05, %v1280_v29 }
 0x971   :  { %2512 = vrsqrt.f32 %v1281_v30 }
 0x97b   :  { %v2513_v31 = vpop.eup %2512 }
 0x97c   :  { %v1284_v33 = vrot.slane %v2513_v31, 1 }
 0x97e   :  { %v1286_v34 = vmul.f32 %v1284_v33, %v56_v32 }
 0x980   :  { %v1287_v35 = vmul.f32 %v1286_v34, %v1274_v19 }
 0x982   :  { %v1289_v20 = vrot.slane %v1287_v35, 7 }
 0x984   :  { %v1291_v36 = vsub.f32 %v56_v32, %v1289_v20 }
 0x986   :  { %v1292_v26 = vsel %vm435_vm2, %v1286_v34, %v1291_v36 }
 0x987   :  { %2281 = vmatmul.mubr.f32.vlgmr.msra.gmra.mrb[16].mxu0 %v1292_v26 }
 0xa5a   :  { %v1392_v42 = vpop.f32.mrb[16].mxu0 }
 0xa5b   :  { %v1399_v43 = vrot.slane %v1392_v42, %v2703_v21  ;;  %v2282_v44 = vpop.f32.mrb[17].mxu0  ;;  %v1404_v46 = vrot.slane %v1392_v42, %v2772_v25 }
 0xa5d   :  { %v1400_v45 = vmul.f32 %v1399_v43, %v2827_v49 }
 0xa5f   :  { %v1405_v47 = vadd.f32 %v1404_v46, %v1400_v45 }
 0xa61   :  { %v1406_v48 = vmax.f32 %v1405_v47, 0.0 }
 0xa63   :  { %v1407_v37 = vpack.c.bf16 %v1406_v48, %v1406_v48 }
 0xa65   :  { %2300 = vmatmul.mubr.bf16.vlgmr.msra.gmra.mrb[16].mxu1 %v1407_v37 }
 0xb38   :  { %v1511_v51 = vpop.f32.mrb[16].mxu1 }
 0xb39   :  { %v1512_v52 = vadd.f32 %v1511_v51, %v1428_v50  ;;  %v2301_v0 = vpop.f32.mrb[17].mxu1 }
 0xb3a   :  { %v1514_v53 = vpop.f32.mrb[18].mxu1 }
 0xb3b   :  { %2514 = vtanh.f32 %v1512_v52  ;;  %v2302_v54 = vpop.f32.mrb[19].mxu1 }
 0xb45   :  { %v2515_v21 = vpop.eup %2514 }
 0xb46   :  { %1518 = vst [vmem:[#allocation8] sm:$0x3] %v2515_v21 }
 0xb47   :  { %2593 = shalt.err (!%p2590_p0)
}
 0xb48   :  { %s2594_s27 = scalar_lea.hbm %s2872_s3, 32 }
 0xb49   :  { %p2595_p1 = scmp.ne.s32.totalorder %s2872_s3, %s2594_s27  ;;  %p2598_p2 = scmp.lt.u32.totalorder %s2594_s27, %s2872_s3 }
 0xb4b   :  { %p2600_p3 = pnand %p2598_p2, %p2595_p1 }
 0xb4d   :  { %2603 = shalt.err (!%p2600_p3)
}
 0xb4e   :  { %1528 = dma.vmem_to_hbm [thread:$0]  %s1526_s23, 32, %s2872_s3, [#allocation4]  }
 0xb4f   :  { %2608 = dma.done.wait [#allocation4], 32  }
 0xb50   :  { %2609 = vsyncadd [#allocation4], 4294967264 }
 0xb51   :  { %1532 = vsyncpa [#allocation3], 1 }
 0xb52   :  { %1533 = vsyncpa [#allocation6], 1 }
 0xb53   :  { %1534 = vsyncpa [#allocation4], 1 }

</bundles_post_ra>
